<compile_context>
chip_gen: v7x
topology: tpu7x:2x2x1
jax: 0.10.0
libtpu: 0.0.40
codegen_flags: <defaults>
</compile_context>

<pallas_src>
import functools

import jax
import jax.numpy as jnp
from jax.experimental import pallas as pl
from jax.experimental.pallas import tpu as pltpu

FILTERS = 10
KSIZE = 3
SPATIAL = 5                                   # feature_size = 10*25 => conv output is 5x5
FEATURE_SIZE = FILTERS * SPATIAL * SPATIAL    # 250
HIDDEN = 16
LANE = 128


def _round_up(x, m):
    return (x + m - 1) // m * m


# ---------------- fused Pallas kernel (hot path) ----------------

def _fused_kernel(x_ref, mc_ref, bc_ref, w1_ref, b1_ref, w2_ref, b2_ref, out_ref):
    # x:  [Bt, C*25]   (compute dtype, e.g. bf16)
    # mc: [C*25, 250]  conv as band matrix; bc: [1, 250] f32
    # w1: [250, 16];   b1: [1, 16] f32
    # w2: [16, Lpad];  b2: [1, Lpad] f32  (zero-padded to a multiple of 128 lanes)
    conv = jnp.dot(x_ref[...], mc_ref[...], preferred_element_type=jnp.float32)
    conv = jnp.maximum(conv + bc_ref[...], 0.0)                       # [Bt, 250] f32

    h = jnp.dot(conv.astype(w1_ref.dtype), w1_ref[...],
                preferred_element_type=jnp.float32)
    h = jnp.maximum(h + b1_ref[...], 0.0)                             # [Bt, 16] f32

    logits = jnp.dot(h.astype(w2_ref.dtype), w2_ref[...],
                     preferred_element_type=jnp.float32) + b2_ref[...]
    # exp on EUP; exact reciprocal keeps the f32-validation path within 1e-5.
    out_ref[...] = pl.reciprocal(1.0 + jnp.exp(-logits), approx=False)


# ---------------- one-time parameter preparation ----------------

def _build_conv_matrix(conv_w):
    """conv_w: [F, C, 3, 3] -> M: [C*25, F*25].

    M[c*25 + q, f*25 + p] = conv_w[f, c, dh, dw] where q is the (zero-padded)
    source pixel of output pixel p under tap (dh, dw); invalid taps are 0.
    x.reshape(B, C*25) @ M reproduces PyTorch's conv + flatten (f*25 + p order).
    """
    f_, c_, _, _ = conv_w.shape
    hh = jnp.arange(SPATIAL)[:, None]
    ww = jnp.arange(SPATIAL)[None, :]
    q_idx = jnp.arange(SPATIAL * SPATIAL)
    m = jnp.zeros((c_, SPATIAL * SPATIAL, f_, SPATIAL * SPATIAL), jnp.float32)
    for dh in range(KSIZE):
        for dw in range(KSIZE):
            sh = hh + (dh - 1)
            sw = ww + (dw - 1)
            valid = ((sh >= 0) & (sh < SPATIAL) & (sw >= 0) & (sw < SPATIAL)).reshape(-1)
            q = (sh * SPATIAL + sw).reshape(-1)                                  # [25] per output p
            onehot = ((q_idx[:, None] == q[None, :]) & valid[None, :]).astype(jnp.float32)  # [25(q),25(p)]
            w_tap = conv_w[:, :, dh, dw].astype(jnp.float32)                     # [F, C]
            m = m + w_tap.T[:, None, :, None] * onehot[None, :, None, :]
    return m.reshape(c_ * SPATIAL * SPATIAL, f_ * SPATIAL * SPATIAL)


def prepare_params(params, compute_dtype=jnp.bfloat16):
    """Hoisted weight prep: run once, reuse across forward calls."""
    action_dim = params["lin2_w"].shape[0]
    out_lanes = _round_up(action_dim, LANE)                 # lane-dense final store
    w2 = jnp.zeros((HIDDEN, out_lanes), jnp.float32).at[:, :action_dim].set(params["lin2_w"].T)
    b2 = jnp.zeros((1, out_lanes), jnp.float32).at[:, :action_dim].set(params["lin2_b"][None, :])
    return dict(
        conv_m=_build_conv_matrix(params["conv_w"]).astype(compute_dtype),
        conv_b=jnp.repeat(params["conv_b"], SPATIAL * SPATIAL)[None, :].astype(jnp.float32),
        lin1_w=params["lin1_w"].T.astype(compute_dtype),    # [250, 16]
        lin1_b=params["lin1_b"][None, :].astype(jnp.float32),
        lin2_w=w2.astype(compute_dtype),
        lin2_b=b2,
        action_dim=action_dim,
        out_lanes=out_lanes,
        compute_dtype=compute_dtype,
    )


# ---------------- forward ----------------

def miniconv_forward(prep, x, *, block_rows=None):
    b, c, h, w = x.shape
    assert h == SPATIAL and w == SPATIAL, "MiniConv requires 5x5 spatial input"
    k_cols = c * SPATIAL * SPATIAL
    out_lanes = prep["out_lanes"]

    x_flat = x.reshape(b, k_cols).astype(prep["compute_dtype"])

    # Batch tile: multiple of 8 sublanes, capped so the per-step VMEM footprint
    # (double-buffered x tile + out tile + resident weights + f32 intermediates,
    # ~3 MiB at 1024 rows) stays far below v7x's 32 MiB default scoped limit.
    if block_rows is None:
        block_rows = min(1024, _round_up(b, 8))
    block_rows = max(8, _round_up(block_rows, 8))
    bp = _round_up(b, block_rows)
    if bp != b:
        x_flat = jnp.pad(x_flat, ((0, bp - b), (0, 0)))

    full = lambda shape: pl.BlockSpec(shape, lambda i: (0, 0))   # resident weights

    out = pl.pallas_call(
        _fused_kernel,
        out_shape=jax.ShapeDtypeStruct((bp, out_lanes), jnp.float32),
        grid=(bp // block_rows,),
        in_specs=[
            pl.BlockSpec((block_rows, k_cols), lambda i: (i, 0)),
            full((k_cols, FEATURE_SIZE)),
            full((1, FEATURE_SIZE)),
            full((FEATURE_SIZE, HIDDEN)),
            full((1, HIDDEN)),
            full((HIDDEN, out_lanes)),
            full((1, out_lanes)),
        ],
        out_specs=pl.BlockSpec((block_rows, out_lanes), lambda i: (i, 0)),
        compiler_params=pltpu.CompilerParams(
            dimension_semantics=("parallel",),   # v7x: shard batch tiles across 2 TCs
        ),
    )(x_flat, prep["conv_m"], prep["conv_b"], prep["lin1_w"], prep["lin1_b"],
      prep["lin2_w"], prep["lin2_b"])

    return out[:b, :prep["action_dim"]]


# ---------------- plain-JAX reference & init ----------------

def init_params(key, state_dim, action_dim):
    ks = jax.random.split(key, 6)
    fan_conv = state_dim * KSIZE * KSIZE
    u = lambda k, shape, fan: (jax.random.uniform(k, shape, jnp.float32, -1.0, 1.0)
                               / jnp.sqrt(float(fan)))
    return dict(
        conv_w=u(ks[0], (FILTERS, state_dim, KSIZE, KSIZE), fan_conv),
        conv_b=u(ks[1], (FILTERS,), fan_conv),
        lin1_w=u(ks[2], (HIDDEN, FEATURE_SIZE), FEATURE_SIZE),
        lin1_b=u(ks[3], (HIDDEN,), FEATURE_SIZE),
        lin2_w=u(ks[4], (action_dim, HIDDEN), HIDDEN),
        lin2_b=u(ks[5], (action_dim,), HIDDEN),
    )


def miniconv_reference(params, x):
    conv = jax.lax.conv_general_dilated(
        x, params["conv_w"], window_strides=(1, 1), padding=((1, 1), (1, 1)),
        dimension_numbers=("NCHW", "OIHW", "NCHW"))
    conv = jnp.maximum(conv + params["conv_b"][None, :, None, None], 0.0)
    f = conv.reshape(x.shape[0], -1)
    h = jnp.maximum(f @ params["lin1_w"].T + params["lin1_b"], 0.0)
    return jax.nn.sigmoid(h @ params["lin2_w"].T + params["lin2_b"])


if __name__ == "__main__":
    key = jax.random.PRNGKey(0)
    k_x, k_p, k_x2 = jax.random.split(key, 3)

    batch, state_dim, action_dim = 2, 4, 3
    x = jax.random.normal(k_x, (batch, state_dim, SPATIAL, SPATIAL), jnp.float32)
    params = init_params(k_p, state_dim, action_dim)
    ref = jax.block_until_ready(miniconv_reference(params, x))

    # 1) f32 compute path: validates the fused band-matrix formulation exactly.
    prep_f32 = prepare_params(params, compute_dtype=jnp.float32)
    out_f32 = jax.block_until_ready(miniconv_forward(prep_f32, x))
    assert out_f32.shape == (batch, action_dim)
    assert jnp.allclose(out_f32, ref, atol=1e-5, rtol=1e-5)

    # 2) bf16 production path: halves HBM traffic for the matmul operands.
    prep_bf16 = prepare_params(params, compute_dtype=jnp.bfloat16)
    out_bf16 = jax.block_until_ready(miniconv_forward(prep_bf16, x))
    assert out_bf16.shape == (batch, action_dim)
    assert jnp.allclose(out_bf16, ref, atol=2e-2)

    # 3) multi-tile grid path: exercises batch tiling / pipelining / padding.
    x2 = jax.random.normal(k_x2, (40, state_dim, SPATIAL, SPATIAL), jnp.float32)
    ref2 = jax.block_until_ready(miniconv_reference(params, x2))
    out2 = jax.block_until_ready(miniconv_forward(prep_bf16, x2, block_rows=16))
    assert out2.shape == (40, action_dim)
    assert jnp.allclose(out2, ref2, atol=2e-2)

    print("KERNEL_OK")
</pallas_src>

<mosaic_0001>
module attributes {stable_mosaic.version = 11 : i64} {
  func.func @_fused_kernel(%arg0: i32, %arg1: memref<8x100xf32, #tpu.memory_space<vmem>>, %arg2: memref<100x250xf32, #tpu.memory_space<vmem>>, %arg3: memref<1x250xf32, #tpu.memory_space<vmem>>, %arg4: memref<250x16xf32, #tpu.memory_space<vmem>>, %arg5: memref<1x16xf32, #tpu.memory_space<vmem>>, %arg6: memref<16x128xf32, #tpu.memory_space<vmem>>, %arg7: memref<1x128xf32, #tpu.memory_space<vmem>>, %arg8: memref<8x128xf32, #tpu.memory_space<vmem>>) attributes {dimension_semantics = [#tpu.dimension_semantics<parallel>], iteration_bounds = array<i64: 1>, scalar_prefetch = 0 : i64, scratch_operands = 0 : i64, tpu.core_type = #tpu.core_type<tc>, window_params = [{transform_indices = @transform_0, window_bounds = array<i64: 8, 100>}, {pipeline_mode = #tpu.pipeline_mode<synchronous>, transform_indices = @transform_1, window_bounds = array<i64: 100, 250>}, {pipeline_mode = #tpu.pipeline_mode<synchronous>, transform_indices = @transform_2, window_bounds = array<i64: 1, 250>}, {pipeline_mode = #tpu.pipeline_mode<synchronous>, transform_indices = @transform_3, window_bounds = array<i64: 250, 16>}, {pipeline_mode = #tpu.pipeline_mode<synchronous>, transform_indices = @transform_4, window_bounds = array<i64: 1, 16>}, {pipeline_mode = #tpu.pipeline_mode<synchronous>, transform_indices = @transform_5, window_bounds = array<i64: 16, 128>}, {pipeline_mode = #tpu.pipeline_mode<synchronous>, transform_indices = @transform_6, window_bounds = array<i64: 1, 128>}, {transform_indices = @transform_7, window_bounds = array<i64: 8, 128>}]} {
    %c0 = arith.constant 0 : index
    %c0_0 = arith.constant 0 : index
    %0 = vector.load %arg1[%c0, %c0_0] : memref<8x100xf32, #tpu.memory_space<vmem>>, vector<8x100xf32>
    %c0_1 = arith.constant 0 : index
    %c0_2 = arith.constant 0 : index
    %1 = vector.load %arg2[%c0_1, %c0_2] : memref<100x250xf32, #tpu.memory_space<vmem>>, vector<100x250xf32>
    %cst = arith.constant dense<0.000000e+00> : vector<8x250xf32>
    %2 = tpu.matmul %0, %1, %cst {dimension_numbers = #tpu.dot_dimension_numbers<[1], [0], [0], [1], [0, 0, 1, 1], [], []>} : vector<8x100xf32>, vector<100x250xf32>, vector<8x250xf32> -> vector<8x250xf32>
    %c0_3 = arith.constant 0 : index
    %c0_4 = arith.constant 0 : index
    %3 = vector.load %arg3[%c0_3, %c0_4] : memref<1x250xf32, #tpu.memory_space<vmem>>, vector<1x250xf32>
    %4 = vector.broadcast %3 : vector<1x250xf32> to vector<8x250xf32>
    %5 = arith.addf %2, %4 : vector<8x250xf32>
    %cst_5 = arith.constant 0.000000e+00 : f32
    %6 = vector.broadcast %cst_5 : f32 to vector<8x250xf32>
    %7 = arith.maximumf %5, %6 : vector<8x250xf32>
    %c0_6 = arith.constant 0 : index
    %c0_7 = arith.constant 0 : index
    %8 = vector.load %arg4[%c0_6, %c0_7] : memref<250x16xf32, #tpu.memory_space<vmem>>, vector<250x16xf32>
    %cst_8 = arith.constant dense<0.000000e+00> : vector<8x16xf32>
    %9 = tpu.matmul %7, %8, %cst_8 {dimension_numbers = #tpu.dot_dimension_numbers<[1], [0], [0], [1], [0, 0, 1, 1], [], []>} : vector<8x250xf32>, vector<250x16xf32>, vector<8x16xf32> -> vector<8x16xf32>
    %c0_9 = arith.constant 0 : index
    %c0_10 = arith.constant 0 : index
    %10 = vector.load %arg5[%c0_9, %c0_10] : memref<1x16xf32, #tpu.memory_space<vmem>>, vector<1x16xf32>
    %11 = vector.broadcast %10 : vector<1x16xf32> to vector<8x16xf32>
    %12 = arith.addf %9, %11 : vector<8x16xf32>
    %cst_11 = arith.constant 0.000000e+00 : f32
    %13 = vector.broadcast %cst_11 : f32 to vector<8x16xf32>
    %14 = arith.maximumf %12, %13 : vector<8x16xf32>
    %c0_12 = arith.constant 0 : index
    %c0_13 = arith.constant 0 : index
    %15 = vector.load %arg6[%c0_12, %c0_13] : memref<16x128xf32, #tpu.memory_space<vmem>>, vector<16x128xf32>
    %cst_14 = arith.constant dense<0.000000e+00> : vector<8x128xf32>
    %16 = tpu.matmul %14, %15, %cst_14 {dimension_numbers = #tpu.dot_dimension_numbers<[1], [0], [0], [1], [0, 0, 1, 1], [], []>} : vector<8x16xf32>, vector<16x128xf32>, vector<8x128xf32> -> vector<8x128xf32>
    %c0_15 = arith.constant 0 : index
    %c0_16 = arith.constant 0 : index
    %17 = vector.load %arg7[%c0_15, %c0_16] : memref<1x128xf32, #tpu.memory_space<vmem>>, vector<1x128xf32>
    %18 = vector.broadcast %17 : vector<1x128xf32> to vector<8x128xf32>
    %19 = arith.addf %16, %18 : vector<8x128xf32>
    %cst_17 = arith.constant 0.000000e+00 : f32
    %20 = vector.broadcast %cst_17 : f32 to vector<8x128xf32>
    %21 = arith.subf %20, %19 : vector<8x128xf32>
    %22 = math.exp %21 : vector<8x128xf32>
    %cst_18 = arith.constant 1.000000e+00 : f32
    %23 = vector.broadcast %cst_18 : f32 to vector<8x128xf32>
    %24 = arith.addf %23, %22 : vector<8x128xf32>
    %25 = tpu.reciprocal %24 : vector<8x128xf32> -> vector<8x128xf32>
    %c0_19 = arith.constant 0 : index
    %c0_20 = arith.constant 0 : index
    %26 = vector.load %arg8[%c0_19, %c0_20] : memref<8x128xf32, #tpu.memory_space<vmem>>, vector<8x128xf32>
    tpu.vector_store %arg8[%c0_19, %c0_20], %25 {strides = array<i32>} : memref<8x128xf32, #tpu.memory_space<vmem>>, vector<8x128xf32>,
    return
  }
  func.func @transform_0(%arg0: i32) -> (i32, i32) {
    %c0_i32 = arith.constant 0 : i32
    %c0_i32_0 = arith.constant 0 : i32
    return %arg0, %c0_i32 : i32, i32
  }
  func.func @transform_1(%arg0: i32) -> (i32, i32) {
    %c0_i32 = arith.constant 0 : i32
    %c0_i32_0 = arith.constant 0 : i32
    %c0_i32_1 = arith.constant 0 : i32
    return %c0_i32, %c0_i32_0 : i32, i32
  }
  func.func @transform_2(%arg0: i32) -> (i32, i32) {
    %c0_i32 = arith.constant 0 : i32
    %c0_i32_0 = arith.constant 0 : i32
    %c0_i32_1 = arith.constant 0 : i32
    return %c0_i32, %c0_i32_0 : i32, i32
  }
  func.func @transform_3(%arg0: i32) -> (i32, i32) {
    %c0_i32 = arith.constant 0 : i32
    %c0_i32_0 = arith.constant 0 : i32
    %c0_i32_1 = arith.constant 0 : i32
    return %c0_i32, %c0_i32_0 : i32, i32
  }
  func.func @transform_4(%arg0: i32) -> (i32, i32) {
    %c0_i32 = arith.constant 0 : i32
    %c0_i32_0 = arith.constant 0 : i32
    %c0_i32_1 = arith.constant 0 : i32
    return %c0_i32, %c0_i32_0 : i32, i32
  }
  func.func @transform_5(%arg0: i32) -> (i32, i32) {
    %c0_i32 = arith.constant 0 : i32
    %c0_i32_0 = arith.constant 0 : i32
    %c0_i32_1 = arith.constant 0 : i32
    return %c0_i32, %c0_i32_0 : i32, i32
  }
  func.func @transform_6(%arg0: i32) -> (i32, i32) {
    %c0_i32 = arith.constant 0 : i32
    %c0_i32_0 = arith.constant 0 : i32
    %c0_i32_1 = arith.constant 0 : i32
    return %c0_i32, %c0_i32_0 : i32, i32
  }
  func.func @transform_7(%arg0: i32) -> (i32, i32) {
    %c0_i32 = arith.constant 0 : i32
    %c0_i32_0 = arith.constant 0 : i32
    return %arg0, %c0_i32 : i32, i32
  }
}

</mosaic_0001>

<bundles_post_ra>
// kernel: tpu_custom_call.1
= control target key start
LH: loop header
LB: loop body
LE: loop exit
PB: predicated region body
PF: predicated region fallthrough
CT: control target
= control target key end

     0   :  { %v517_v7 = vmov 0.0   ;;  %s770_s0 = inlined_call_operand.vmem [shape: f32[8,100], index: 0, kind: input, shape index: {}]   ;;  %s771_s1 = inlined_call_operand.vmem [shape: f32[100,250], index: 1, kind: input, shape index: {}]   ;;  %s772_s2 = inlined_call_operand.vmem [shape: f32[1,250], index: 2, kind: input, shape index: {}]   ;;  %s773_s3 = inlined_call_operand.vmem [shape: f32[250,16], index: 3, kind: input, shape index: {}]   ;;  %s774_s4 = inlined_call_operand.vmem [shape: f32[1,16], index: 4, kind: input, shape index: {}]   ;;  %s775_s5 = inlined_call_operand.vmem [shape: f32[16,128], index: 5, kind: input, shape index: {}]   ;;  %s776_s6 = inlined_call_operand.vmem [shape: f32[1,128], index: 6, kind: input, shape index: {}]   ;;  %s777_s7 = inlined_call_operand.hbm [shape: f32[8,128], index: 7, kind: output, shape index: {}]  }
   0x1   :  { %v29_v0 = vld [vmem:[%s771_s1 + $0x8] sm:$0xff]  ;;  %v31_v1 = vld [vmem:[%s771_s1 + $0x18] sm:$0xff]  ;;  %v28_v2 = vld [vmem:[%s771_s1] sm:$0xff]  ;;  %141 = vmatprep.mubr.f32.mxu0 %v517_v7 }
   0x2   :  { %v424_v3 = vpack.c.bf16 %v31_v1, %v29_v0  ;;  %v30_v4 = vld [vmem:[%s771_s1 + $0x10] sm:$0xff]  ;;  %v33_v5 = vld [vmem:[%s771_s1 + $0x28] sm:$0xff]  ;;  %v35_v6 = vld [vmem:[%s771_s1 + $0x38] sm:$0xff] }
   0x3   :  { %v426_v8 = vpack.c.bf16 %v30_v4, %v28_v2  ;;  %v428_v9 = vpack.c.bf16 %v35_v6, %v33_v5  ;;  %v32_v10 = vld [vmem:[%s771_s1 + $0x20] sm:$0xff]  ;;  %v34_v11 = vld [vmem:[%s771_s1 + $0x30] sm:$0xff]  ;;  %v37_v12 = vld [vmem:[%s771_s1 + $0x48] sm:$0xff] }
   0x4   :  { %425 = vmatprep.subr.bf16.mxu0 %v424_v3  ;;  %v39_v13 = vld [vmem:[%s771_s1 + $0x58] sm:$0xff]  ;;  %v430_v14 = vpack.c.bf16 %v34_v11, %v32_v10  ;;  %v36_v16 = vld [vmem:[%s771_s1 + $0x40] sm:$0xff]  ;;  %v38_v17 = vld [vmem:[%s771_s1 + $0x50] sm:$0xff] }
   0x5   :  { %427 = vmatpush1.bf16.msra.mxu0 %v426_v8  ;;  %v432_v15 = vpack.c.bf16 %v39_v13, %v37_v12  ;;  %v41_v18 = vld [vmem:[%s771_s1 + $0x68] sm:$0xff]  ;;  %v43_v19 = vld [vmem:[%s771_s1 + $0x78] sm:$0xff]  ;;  %v40_v20 = vld [vmem:[%s771_s1 + $0x60] sm:$0xff]  ;;  %v434_v21 = vpack.c.bf16 %v38_v17, %v36_v16 }
   0x6   :  { %429 = vmatprep.subr.bf16.mxu0 %v428_v9  ;;  %v42_v22 = vld [vmem:[%s771_s1 + $0x70] sm:$0xff]  ;;  %v45_v23 = vld [vmem:[%s771_s1 + $0x88] sm:$0xff]  ;;  %v47_v24 = vld [vmem:[%s771_s1 + $0x98] sm:$0xff]  ;;  %v436_v25 = vpack.c.bf16 %v43_v19, %v41_v18 }
   0x7   :  { %v166_v26 = vld [vmem:[%s773_s3 + $0x80] sm:$0xff]  ;;  %v167_v27 = vld [vmem:[%s773_s3 + $0x88] sm:$0xff]  ;;  %v168_v31 = vld [vmem:[%s773_s3 + $0x90] sm:$0xff]  ;;  %v438_v38 = vpack.c.bf16 %v42_v22, %v40_v20  ;;  %v440_v40 = vpack.c.bf16 %v47_v24, %v45_v23 }
   0x8   :  { %v150_v28 = vld [vmem:[%s773_s3] sm:$0xff]  ;;  %v448_v29 = vpack.c.bf16 %v167_v27, %v166_v26  ;;  %v151_v30 = vld [vmem:[%s773_s3 + $0x8] sm:$0xff]  ;;  %v169_v32 = vld [vmem:[%s773_s3 + $0x98] sm:$0xff] }
   0x9   :  { %431 = vmatpush1.bf16.msra.mxu0 %v430_v14  ;;  %v450_v33 = vpack.c.bf16 %v151_v30, %v150_v28  ;;  %v452_v34 = vpack.c.bf16 %v169_v32, %v168_v31  ;;  %v152_v35 = vld [vmem:[%s773_s3 + $0x10] sm:$0xff]  ;;  %v153_v36 = vld [vmem:[%s773_s3 + $0x18] sm:$0xff]  ;;  %v170_v37 = vld [vmem:[%s773_s3 + $0xa0] sm:$0xff] }
   0xa   :  { %433 = vmatprep.subr.bf16.mxu0 %v432_v15  ;;  %449 = vmatprep.subr.bf16.mxu1 %v448_v29  ;;  %v171_v39 = vld [vmem:[%s773_s3 + $0xa8] sm:$0xff]  ;;  %v44_v41 = vld [vmem:[%s771_s1 + $0x80] sm:$0xff]  ;;  %v46_v42 = vld [vmem:[%s771_s1 + $0x90] sm:$0xff]  ;;  %v454_v44 = vpack.c.bf16 %v153_v36, %v152_v35 }
   0xb   :  { %v49_v43 = vld [vmem:[%s771_s1 + $0xa8] sm:$0xff]  ;;  %451 = vmatpush3.bf16.msra.mxu1 %v450_v33  ;;  %v51_v45 = vld [vmem:[%s771_s1 + $0xb8] sm:$0xff]  ;;  %v456_v46 = vpack.c.bf16 %v171_v39, %v170_v37  ;;  %v154_v47 = vld [vmem:[%s773_s3 + $0x20] sm:$0xff]  ;;  %v442_v51 = vpack.c.bf16 %v46_v42, %v44_v41 }
   0xc   :  { %453 = vmatprep.subr.bf16.mxu1 %v452_v34  ;;  %v155_v48 = vld [vmem:[%s773_s3 + $0x28] sm:$0xff]  ;;  %v172_v49 = vld [vmem:[%s773_s3 + $0xb0] sm:$0xff]  ;;  %v173_v50 = vld [vmem:[%s773_s3 + $0xb8] sm:$0xff]  ;;  %v444_v52 = vpack.c.bf16 %v51_v45, %v49_v43 }
   0xd   :  { %435 = vmatpush1.bf16.msra.mxu0 %v434_v21  ;;  %v48_v53 = vld [vmem:[%s771_s1 + $0xa0] sm:$0xff]  ;;  %v50_v54 = vld [vmem:[%s771_s1 + $0xb0] sm:$0xff]  ;;  %v458_v55 = vpack.c.bf16 %v155_v48, %v154_v47  ;;  %v460_v56 = vpack.c.bf16 %v173_v50, %v172_v49  ;;  %v157_v58 = vld [vmem:[%s773_s3 + $0x38] sm:$0xff] }
   0xe   :  { %437 = vmatprep.subr.bf16.mxu0 %v436_v25  ;;  %v156_v57 = vld [vmem:[%s773_s3 + $0x30] sm:$0xff] }
   0xf   :  { %455 = vmatpush3.bf16.msra.mxu1 %v454_v44 }
  0x10   :  { %457 = vmatprep.subr.bf16.mxu1 %v456_v46 }
  0x11   :  { %439 = vmatpush1.bf16.msra.mxu0 %v438_v38 }
  0x12   :  { %441 = vmatprep.subr.bf16.mxu0 %v440_v40 }
  0x13   :  { %12 = vsyncpa [#allocation3], 0  ;;  %v174_v59 = vld [vmem:[%s773_s3 + $0xc0] sm:$0xff]  ;;  %v175_v60 = vld [vmem:[%s773_s3 + $0xc8] sm:$0xff]  ;;  %v446_v61 = vpack.c.bf16 %v50_v54, %v48_v53  ;;  %459 = vmatpush3.bf16.msra.mxu1 %v458_v55  ;;  %v462_v62 = vpack.c.bf16 %v157_v58, %v156_v57  ;;  %vm70_vm0 = vcmask 1043456   ;;  %vm66_vm1 = vcmask 818176  }
  0x14   :  { %v53_v63 = vld [vmem:[%s771_s1 + $0xc8] sm:$0xf]  ;;  %461 = vmatprep.subr.bf16.mxu1 %v460_v56  ;;  %v464_v0 = vpack.c.bf16 %v175_v60, %v174_v59  ;;  %v158_v1 = vld [vmem:[%s773_s3 + $0x40] sm:$0xff]  ;;  %v176_v3 = vld [vmem:[%s773_s3 + $0xd0] sm:$0xff]  ;;  %vm193_vm2 = vcmask 1041408   ;;  %vm518_vm3 = vmmov 1   ;;  %v56_v25 = vlaneseq }
  0x15   :  { %443 = vmatpush1.bf16.msra.mxu0 %v442_v51  ;;  %v159_v2 = vld [vmem:[%s773_s3 + $0x48] sm:$0xff]  ;;  %v177_v4 = vld [vmem:[%s773_s3 + $0xd8] sm:$0xff]  ;;  %v52_v5 = vld [vmem:[%s771_s1 + $0xc0] sm:$0xf]  ;;  %vm189_vm5 = vcmask 998400   ;;  %v519_v41 = vmov 0.0|0.0  }
  0x16   :  { %445 = vmatprep.subr.bf16.mxu0 %v444_v52  ;;  %v466_v6 = vpack.c.bf16 %v159_v2, %v158_v1  ;;  %v27_v8 = vld [vmem:[%s770_s0] sm:$0xff]  ;;  %v468_v9 = vpack.c.bf16 %v177_v4, %v176_v3  ;;  %v160_v10 = vld [vmem:[%s773_s3 + $0x50] sm:$0xff]  ;;  %v161_v11 = vld [vmem:[%s773_s3 + $0x58] sm:$0xff]  ;;  %v57_v26 = vshrl.u32 %v56_v25, 7  ;;  %vm520_vm6 = vmmov 0  }
  0x17   :  { %463 = vmatpush3.bf16.msra.mxu1 %v462_v62  ;;  %v178_v12 = vld [vmem:[%s773_s3 + $0xe0] sm:$0xff]  ;;  %v179_v13 = vld [vmem:[%s773_s3 + $0xe8] sm:$0xff]  ;;  %v470_v14 = vpack.c.bf16 %v161_v11, %v160_v10  ;;  %v180_v19 = vld [vmem:[%s773_s3 + $0xf0] sm:$0xff]  ;;  %vm277_vm7 = vcmask 130048  }
  0x18   :  { %465 = vmatprep.subr.bf16.mxu1 %v464_v0  ;;  %v472_v15 = vpack.c.bf16 %v179_v13, %v178_v12  ;;  %v162_v16 = vld [vmem:[%s773_s3 + $0x60] sm:$0xff]  ;;  %v163_v17 = vld [vmem:[%s773_s3 + $0x68] sm:$0xff]  ;;  %v181_v20 = vld [vmem:[%s773_s3 + $0xf8] sm:$0x3]  ;;  %v58_v27 = vsub.s32 0, %v57_v26  ;;  %v62_v29 = vsub.s32 1, %v57_v26 }
  0x19   :  { %447 = vmatpush1.bf16.msra.mxu0 %v446_v61  ;;  %v474_v18 = vpack.c.bf16 %v163_v17, %v162_v16  ;;  %v476_v21 = vpack.c.bf16 %v181_v20, %v180_v19  ;;  %v164_v22 = vld [vmem:[%s773_s3 + $0x70] sm:$0xff]  ;;  %v165_v23 = vld [vmem:[%s773_s3 + $0x78] sm:$0xff]  ;;  %vm477_vm4 = vmpackc.low %vm193_vm2, %vm518_vm3 }
  0x1a   :  { %371 = vmatprep.subr.msk.mxu0 %vm70_vm0, %v53_v63  ;;  %v479_v24 = vpack.c.bf16 %v165_v23, %v164_v22  ;;  %v54_v28 = vld [vmem:[%s772_s2] sm:$0x3]  ;;  %v269_v39 = vld [vmem:[%s775_s5 + $0x8] sm:$0xff] }
  0x1b   :  { %467 = vmatpush3.bf16.msra.mxu1 %v466_v6  ;;  %v59_v30 = vrot.slane %v54_v28, %v58_v27  ;;  %v63_v31 = vrot.slane %v54_v28, %v62_v29  ;;  %v268_v38 = vld [vmem:[%s775_s5] sm:$0xff] }
  0x1c   :  { %469 = vmatprep.subr.bf16.mxu1 %v468_v9  ;;  %v482_v40 = vpack.c.bf16 %v269_v39, %v268_v38  ;;  %v374_v43 = vld [vmem:[%s774_s4] ss:$0 sm:$0xff]  ;;  %s521_s4 = smov [#allocation2]  }
  0x1d   :  { %372 = vmatpush1.msk.msra.mxu0 %vm70_vm0, %v52_v5  ;;  %v377_v48 = vld [vmem:[%s776_s6] ss:$0 sm:$0xff]  ;;  %s363_s9 = sshll.u32 %s521_s4, 4  ;;  %s364_s9 = int_to_ptr.vmem [resolvable:$true] %s363_s9 }
  0x1e   :  { %373 = vmatmul.mubr.msk.f32.vlgmr.msra.gmra.mrb[0].mxu0 %vm66_vm1, %v27_v8  ;;  %481 = vmatprep.subr.bf16.mxu0 %v519_v41  ;;  %s493_s10 = scalar_lea.vmem %s364_s9, 128  ;;  %p498_p1 = scmp.lt.s32.totalorder %s364_s9, %s364_s9 }
  0x1f   :  { %471 = vmatpush3.bf16.msra.mxu1 %v470_v14  ;;  %483 = vmatpush3.bf16.msra.mxu0 %v482_v40  ;;  %p494_p0 = scmp.ne.s32.totalorder %s364_s9, %s493_s10  ;;  %p499_p2 = scmp.lt.s32.totalorder %s493_s10, %s493_s10 }
  0x20   :  { %473 = vmatprep.subr.bf16.mxu1 %v472_v15  ;;  %421 = vmatprep.mubr.msk.f32.mxu0 %vm520_vm6, %v517_v7 }
  0x21   :  { %p500_p3 = por %p499_p2, %p498_p1 }
  0x23   :  { %475 = vmatpush3.bf16.msra.mxu1 %v474_v18  ;;  %p501_p4 = pnand %p500_p3, %p494_p0 }
  0x24   :  { %478 = vmatprep.subr.msk.bf16.mxu1 %vm477_vm4, %v476_v21 }
  0x27   :  { %480 = vmatpush3.bf16.msra.mxu1 %v479_v24 }
  0xf1   :  { %v143_v32 = vpop.f32.mrb[0].mxu0 }
  0xf2   :  { %v144_v33 = vadd.f32 %v143_v32, %v59_v30  ;;  %v145_v34 = vpop.f32.mrb[1].mxu0 }
  0xf3   :  { %v146_v35 = vadd.f32 %v145_v34, %v63_v31 }
  0xf4   :  { %v148_v37 = vmax.f32 %v144_v33, 0.0 }
  0xf5   :  { %v149_v36 = vmax.f32 %v146_v35, 0.0 }
  0xf7   :  { %376 = vmatprep.mubr.msk.f32.mxu1 %vm189_vm5, %v149_v36 }
  0xf8   :  { %262 = vmatmul.mubr.f32.vlgmr.msra.gmra.mrb[0].mxu1 %v148_v37 }
 0x1cb   :  { %v411_v42 = vpop.f32.mrb[0].mxu1 }
 0x1cc   :  { %v412_v44 = vpop.f32.mrb[1].mxu1 }
 0x1cd   :  { %v413_v45 = vadd.f32 %v412_v44, %v411_v42 }
 0x1cf   :  { %v264_v46 = vadd.f32 %v413_v45, %v374_v43 }
 0x1d1   :  { %v267_v47 = vmax.f32 %v264_v46, 0.0 }
 0x1d3   :  { %422 = vmatmul.mubr.msk.f32.vlgmr.msra.gmra.mrb[2].mxu0 %vm277_vm7, %v267_v47 }
 0x2a6   :  { %v347_v49 = vpop.f32.mrb[2].mxu0 }
 0x2a7   :  { %v348_v50 = vadd.f32 %v377_v48, %v347_v49  ;;  %v423_v51 = vpop.f32.mrb[3].mxu0 }
 0x2a9   :  { %v351_v52 = vsub.f32 0.0, %v348_v50 }
 0x2ab   :  { %v352_v7 = vmul.f32 1.442695, %v351_v52 }
 0x2ad   :  { %489 = vpow2.f32 %v352_v7 }
 0x2b7   :  { %v490_v53 = vpop.eup %489 }
 0x2b8   :  { %v354_v54 = vadd.f32 1.0, %v490_v53 }
 0x2ba   :  { %491 = vrcp.f32 %v354_v54 }
 0x2c4   :  { %v492_v55 = vpop.eup %491 }
 0x2c5   :  { %356 = vst [vmem:[#allocation2] sm:$0xff] %v492_v55 }
 0x2c6   :  { %504 = shalt.err (!%p501_p4)
}
 0x2c7   :  { %s505_s12 = scalar_lea.hbm %s777_s7, 128 }
 0x2c8   :  { %p506_p5 = scmp.ne.s32.totalorder %s777_s7, %s505_s12  ;;  %p509_p6 = scmp.lt.u32.totalorder %s505_s12, %s777_s7 }
 0x2ca   :  { %p511_p7 = pnand %p509_p6, %p506_p5 }
 0x2cc   :  { %514 = shalt.err (!%p511_p7)
}
 0x2cd   :  { %366 = dma.vmem_to_hbm [thread:$0]  %s364_s9, 128, %s777_s7, [#allocation3]  }
 0x2ce   :  { %515 = dma.done.wait [#allocation3], 128  }
 0x2cf   :  { %516 = vsyncadd [#allocation3], 4294967168 }
 0x2d0   :  { %370 = vsyncpa [#allocation3], 1 }

</bundles_post_ra>
